<compile_context>
chip_gen: v7x
topology: tpu7x:2x2x1
jax: 0.10.0
libtpu: 0.0.40
codegen_flags: <defaults>
</compile_context>

<pallas_src>
import jax
import jax.numpy as jnp
from jax.experimental import pallas as pl
from jax.experimental.pallas import tpu as pltpu

# ---------------------------------------------------------------------------
# Op library (used by the pure-JAX reference; the kernels mirror these ops).
# ---------------------------------------------------------------------------
OP_NAMES = ("add", "sub", "mul", "div", "max", "min", "sin", "cos")
NUM_OPS = len(OP_NAMES)

_OP_LIBRARY = {
    "add": lambda a, b: a + b,
    "sub": lambda a, b: a - b,
    "mul": lambda a, b: a * b,
    # protected division (common choice for symbolic-regression libraries)
    "div": lambda a, b: a / (1.0 + jnp.abs(b)),
    "max": lambda a, b: jnp.maximum(a, b),
    "min": lambda a, b: jnp.minimum(a, b),
    "sin": lambda a, b: jnp.sin(a),
    "cos": lambda a, b: jnp.cos(b),
}


# ---------------------------------------------------------------------------
# Soft-mixture kernel: one (tile_r, 128) batch tile.
#   a = sum_k a_w[k]*x[k];  b = sum_k b_w[k]*x[k]
#   y = c_a*a + c_b*b + w_mul*ab + w_div*(a/(1+|b|)) + c_max*max(a,b) + w_sin*sin(a) + w_cos*cos(b)
#   out = tanh(y)
# (add/sub/min folded into the scalar coefficients c_a, c_b, c_max.)
# ---------------------------------------------------------------------------
def _make_soft_kernel(approx_div):
    def kernel(opw_ref, aw_ref, bw_ref, x_ref, o_ref):
        # opw_ref:(8,) f32 SMEM; aw_ref/bw_ref:(K,) f32 SMEM
        # x_ref:(K, tile_r, 128) VMEM (f32 or bf16); o_ref:(tile_r, 128) f32 VMEM
        num_in = x_ref.shape[0]
        x0 = x_ref[0].astype(jnp.float32)
        a = aw_ref[0] * x0
        b = bw_ref[0] * x0
        for k in range(1, num_in):                 # K is tiny (~4): unrolled scalar*vector FMAs
            xk = x_ref[k].astype(jnp.float32)
            a = a + aw_ref[k] * xk
            b = b + bw_ref[k] * xk

        w_add = opw_ref[0]
        w_sub = opw_ref[1]
        w_mul = opw_ref[2]
        w_div = opw_ref[3]
        w_max = opw_ref[4]
        w_min = opw_ref[5]
        w_sin = opw_ref[6]
        w_cos = opw_ref[7]
        # Scalar algebra (min = a + b - max); computed once per grid step on the scalar unit.
        c_a = w_add + w_sub + w_min
        c_b = w_add - w_sub + w_min
        c_max = w_max - w_min

        if approx_div:
            div_term = a * pl.reciprocal(1.0 + jnp.abs(b), approx=True)   # EUP slot, ~free
        else:
            div_term = a / (1.0 + jnp.abs(b))

        y = (c_a * a + c_b * b
             + w_mul * (a * b)
             + w_div * div_term
             + c_max * jnp.maximum(a, b)
             + w_sin * jnp.sin(a)
             + w_cos * jnp.cos(b))
        o_ref[...] = jnp.tanh(y)

    return kernel


# ---------------------------------------------------------------------------
# Hard (one-hot) fast-path kernel: only the two selected input rows are DMA'd
# (via the data-dependent index_maps) and only the selected op is evaluated.
# ---------------------------------------------------------------------------
def _make_hard_kernel(approx_div):
    def kernel(idx_ref, xa_ref, xb_ref, o_ref):
        # idx_ref: (3,) i32 SMEM = [op_idx, a_idx, b_idx] (a_idx/b_idx consumed by index_maps)
        # xa_ref/xb_ref: (1, tile_r, 128) VMEM; o_ref: (tile_r, 128) f32 VMEM
        a = xa_ref[0].astype(jnp.float32)
        b = xb_ref[0].astype(jnp.float32)
        op_idx = idx_ref[0]

        if approx_div:
            div_fn = lambda: a * pl.reciprocal(1.0 + jnp.abs(b), approx=True)
        else:
            div_fn = lambda: a / (1.0 + jnp.abs(b))

        branches = (
            lambda: a + b,                 # add
            lambda: a - b,                 # sub
            lambda: a * b,                 # mul
            div_fn,                        # div (protected)
            lambda: jnp.maximum(a, b),     # max
            lambda: jnp.minimum(a, b),     # min
            lambda: jnp.sin(a),            # sin
            lambda: jnp.cos(b),            # cos
        )

        def emit(i, fn):
            @pl.when(op_idx == i)
            def _():
                o_ref[...] = jnp.tanh(fn())

        for i, fn in enumerate(branches):  # exactly one branch fires at runtime
            emit(i, fn)

    return kernel


# ---------------------------------------------------------------------------
# pallas_call wrapper: lane/sublane-dense (K, rows, 128) layout, 1-D batch grid.
# ---------------------------------------------------------------------------
def _symbolic_node_pallas(op_w, a_w, b_w, stacked, *, tile_rows=2048,
                          hard_indices=None, approx_div=True):
    """stacked: (K, N); op_w:(8,), a_w/b_w:(K,) f32.  Returns (N,) f32.

    hard_indices: optional (3,) int32 [op_idx, a_idx, b_idx] -> one-hot fast path.
    """
    K, N = stacked.shape
    itemsize = jnp.dtype(stacked.dtype).itemsize
    sub = 16 if itemsize < 4 else 8               # sublane group (bf16 packs 2 rows/sublane)

    # Pad only to one sublane group of lanes (not a whole tile) -> minimal junk HBM traffic.
    pad_to = sub * 128
    n_pad = ((N + pad_to - 1) // pad_to) * pad_to
    if n_pad != N:
        stacked = jnp.pad(stacked, ((0, 0), (0, n_pad - N)))
    rows = n_pad // 128
    x3 = stacked.reshape(K, rows, 128)            # contiguous reshape (free), lane-dense

    # Round tile size down to the sublane multiple; ragged last block handled by Pallas.
    tile_r = max(sub, (min(int(tile_rows), rows) // sub) * sub)
    grid = (pl.cdiv(rows, tile_r),)

    hard = hard_indices is not None
    rows_read = 2 if hard else K
    in_block_bytes = rows_read * tile_r * 128 * itemsize
    out_block_bytes = tile_r * 128 * 4
    vmem_need = 2 * (in_block_bytes + out_block_bytes)        # double-buffered in + out
    vmem_limit = int(min(max(2 * vmem_need, 32 * 2 ** 20), 64 * 2 ** 20))

    cost = pl.CostEstimate(
        flops=int((4 * rows_read + 16) * n_pad),
        transcendentals=int((1 if hard else 4) * n_pad),      # hard: tanh only (at most +1)
        bytes_accessed=int((rows_read * itemsize + 4) * n_pad),
    )
    cparams = pltpu.CompilerParams(
        dimension_semantics=("parallel",),        # megacore / 2-TC sharding where available
        vmem_limit_bytes=vmem_limit,              # v5e scoped default (16 MiB) too small for big tiles
    )

    if hard:
        grid_spec = pltpu.PrefetchScalarGridSpec(
            num_scalar_prefetch=1,                # [op_idx, a_idx, b_idx] -> SMEM
            grid=grid,
            in_specs=[
                pl.BlockSpec((1, tile_r, 128), lambda i, idx: (idx[1], i, 0)),   # selected a-row
                pl.BlockSpec((1, tile_r, 128), lambda i, idx: (idx[2], i, 0)),   # selected b-row
            ],
            out_specs=pl.BlockSpec((tile_r, 128), lambda i, idx: (i, 0)),
        )
        out = pl.pallas_call(
            _make_hard_kernel(approx_div),
            out_shape=jax.ShapeDtypeStruct((rows, 128), jnp.float32),
            grid_spec=grid_spec,
            compiler_params=cparams,
            cost_estimate=cost,
        )(hard_indices.astype(jnp.int32), x3, x3)
    else:
        grid_spec = pltpu.PrefetchScalarGridSpec(
            num_scalar_prefetch=3,                # op_w, a_w, b_w -> SMEM scalars
            grid=grid,
            in_specs=[pl.BlockSpec((K, tile_r, 128), lambda i, *_: (0, i, 0))],
            out_specs=pl.BlockSpec((tile_r, 128), lambda i, *_: (i, 0)),
        )
        out = pl.pallas_call(
            _make_soft_kernel(approx_div),
            out_shape=jax.ShapeDtypeStruct((rows, 128), jnp.float32),
            grid_spec=grid_spec,
            compiler_params=cparams,
            cost_estimate=cost,
        )(op_w.astype(jnp.float32), a_w.astype(jnp.float32),
          b_w.astype(jnp.float32), x3)

    return out.reshape(n_pad)[:N]


# ---------------------------------------------------------------------------
# Python wrapper reproducing _SymbolicNode.forward (gumbel-softmax glue in JAX,
# weighted-sum / op-mixture / tanh hot path in the Pallas kernels).
# ---------------------------------------------------------------------------
def symbolic_node_forward(inputs, op_logits, a_logits, b_logits, *,
                          key, temperature=5.0, hard=False, tile_rows=2048,
                          stream_dtype=None, approx_div=True):
    t = jnp.maximum(jnp.asarray(temperature, jnp.float32), 0.3)

    def _gs(logits, k):
        noise = jax.random.gumbel(k, logits.shape, dtype=logits.dtype)
        return jax.nn.softmax((logits + noise) / t, axis=-1)

    k_op, k_a, k_b = jax.random.split(key, 3)
    op_w = _gs(op_logits.astype(jnp.float32), k_op)
    a_w = _gs(a_logits.astype(jnp.float32), k_a)
    b_w = _gs(b_logits.astype(jnp.float32), k_b)

    # Accept a pre-stacked (K, N) array directly (avoids an extra HBM pass from jnp.stack
    # when the caller already holds contiguous data); a list of (N,) tensors is stacked
    # exactly like the PyTorch module does.
    if isinstance(inputs, (list, tuple)):
        stacked = jnp.stack(inputs, axis=0)
    else:
        stacked = inputs
    # Optional bf16 streaming (cast back to f32 inside the kernel): ~1.65x the HBM-bound
    # roofline on v5e/v6e at a small accuracy cost. Default f32 matches the module exactly.
    stacked = stacked.astype(stream_dtype if stream_dtype is not None else jnp.float32)

    if hard:
        # Forward value of the straight-through estimator is the hard one-hot, so the forward
        # pass only needs the argmax indices: fetch only the two selected input rows and
        # evaluate only the selected op (also avoids NaN from 0-weight * inf terms).
        # TODO(synk): straight-through gradients are meaningless in a forward-only kernel.
        idx = jnp.stack([jnp.argmax(op_w), jnp.argmax(a_w), jnp.argmax(b_w)]).astype(jnp.int32)
        return _symbolic_node_pallas(op_w, a_w, b_w, stacked, tile_rows=tile_rows,
                                     hard_indices=idx, approx_div=approx_div)
    return _symbolic_node_pallas(op_w, a_w, b_w, stacked, tile_rows=tile_rows,
                                 approx_div=approx_div)


# Pure-JAX reference for sanity checks (exact division in 'div').
def _reference_forward(stacked, op_w, a_w, b_w):
    stacked = stacked.astype(jnp.float32)
    a = jnp.sum(stacked * a_w[:, None], axis=0)
    b = jnp.sum(stacked * b_w[:, None], axis=0)
    res = jnp.stack([_OP_LIBRARY[n](a, b) for n in OP_NAMES], axis=0)
    return jnp.tanh(jnp.sum(op_w[:, None] * res, axis=0))


if __name__ == "__main__":
    key = jax.random.PRNGKey(0)
    k_params, k_inputs, k_noise, k_inputs2 = jax.random.split(key, 4)

    num_inputs = 4
    batch = 16
    temperature = 5.0

    # Deterministic "randn" parameters, matching the nn.Parameter shapes in __init__.
    kp1, kp2, kp3 = jax.random.split(k_params, 3)
    op_logits = jax.random.normal(kp1, (NUM_OPS,), dtype=jnp.float32)
    a_logits = jax.random.normal(kp2, (num_inputs,), dtype=jnp.float32)
    b_logits = jax.random.normal(kp3, (num_inputs,), dtype=jnp.float32)

    # Gumbel-softmax weights recomputed identically for the pure-JAX reference.
    t = jnp.maximum(jnp.asarray(temperature, jnp.float32), 0.3)
    ko, ka, kb = jax.random.split(k_noise, 3)
    op_w = jax.nn.softmax((op_logits + jax.random.gumbel(ko, op_logits.shape)) / t)
    a_w = jax.nn.softmax((a_logits + jax.random.gumbel(ka, a_logits.shape)) / t)
    b_w = jax.nn.softmax((b_logits + jax.random.gumbel(kb, b_logits.shape)) / t)

    # --- Check 1: module-style call with a list of num_inputs (batch,) tensors (soft mode). ---
    xs = jax.random.normal(k_inputs, (num_inputs, batch), dtype=jnp.float32)
    inputs = [xs[i] for i in range(num_inputs)]
    out = symbolic_node_forward(inputs, op_logits, a_logits, b_logits,
                                key=k_noise, temperature=temperature, hard=False)
    out = jax.block_until_ready(out)
    ref = _reference_forward(xs, op_w, a_w, b_w)
    assert out.shape == (batch,)
    assert jnp.allclose(out, ref, atol=2e-3, rtol=2e-3), (out, ref)

    # --- Check 2: pre-stacked batch exercising padding + a multi-step grid with a ragged
    #     last block (rows=24, tile_r=16 -> 2 grid steps, last one masked). ---
    batch2 = 3000
    xs2 = jax.random.normal(k_inputs2, (num_inputs, batch2), dtype=jnp.float32)
    out2 = symbolic_node_forward(xs2, op_logits, a_logits, b_logits,
                                 key=k_noise, temperature=temperature, hard=False,
                                 tile_rows=16)
    out2 = jax.block_until_ready(out2)
    ref2 = _reference_forward(xs2, op_w, a_w, b_w)
    assert out2.shape == (batch2,)
    assert jnp.allclose(out2, ref2, atol=2e-3, rtol=2e-3)

    # --- Check 3: hard (one-hot) fast path: data-dependent input-row fetch + pl.when op switch. ---
    out3 = symbolic_node_forward(xs2, op_logits, a_logits, b_logits,
                                 key=k_noise, temperature=temperature, hard=True)
    out3 = jax.block_until_ready(out3)
    oh = lambda w: jax.nn.one_hot(jnp.argmax(w), w.shape[-1], dtype=jnp.float32)
    ref3 = _reference_forward(xs2, oh(op_w), oh(a_w), oh(b_w))
    assert out3.shape == (batch2,)
    assert jnp.allclose(out3, ref3, atol=5e-3, rtol=5e-3)

    # --- Check 4: bf16 input streaming (HBM-roofline lever on v5e/v6e). ---
    out4 = symbolic_node_forward(xs2, op_logits, a_logits, b_logits,
                                 key=k_noise, temperature=temperature, hard=False,
                                 stream_dtype=jnp.bfloat16)
    out4 = jax.block_until_ready(out4)
    ref4 = _reference_forward(xs2.astype(jnp.bfloat16), op_w, a_w, b_w)
    assert out4.shape == (batch2,)
    assert jnp.allclose(out4, ref4, atol=5e-3, rtol=5e-3)

    print("KERNEL_OK")
</pallas_src>

<mosaic_0001>
module attributes {stable_mosaic.version = 11 : i64} {
  func.func @kernel(%arg0: i32, %arg1: memref<8xf32, #tpu.memory_space<smem>>, %arg2: memref<4xf32, #tpu.memory_space<smem>>, %arg3: memref<4xf32, #tpu.memory_space<smem>>, %arg4: memref<4x8x128xf32, #tpu.memory_space<vmem>>, %arg5: memref<8x128xf32, #tpu.memory_space<vmem>>) attributes {dimension_semantics = [#tpu.dimension_semantics<parallel>], iteration_bounds = array<i64: 1>, scalar_prefetch = 3 : i64, scratch_operands = 0 : i64, tpu.core_type = #tpu.core_type<tc>, window_params = [{transform_indices = @transform_0, window_bounds = array<i64: 4, 8, 128>}, {transform_indices = @transform_1, window_bounds = array<i64: 8, 128>}]} {
    %c0 = arith.constant 0 : index
    %c0_0 = arith.constant 0 : index
    %c0_1 = arith.constant 0 : index
    %0 = vector.load %arg4[%c0, %c0_0, %c0_1] : memref<4x8x128xf32, #tpu.memory_space<vmem>>, vector<1x8x128xf32>
    %1 = vector.shape_cast %0 : vector<1x8x128xf32> to vector<8x128xf32>
    %c0_2 = arith.constant 0 : index
    %2 = memref.load %arg2[%c0_2] : memref<4xf32, #tpu.memory_space<smem>>
    %3 = vector.broadcast %2 : f32 to vector<8x128xf32>
    %4 = arith.mulf %3, %1 : vector<8x128xf32>
    %c0_3 = arith.constant 0 : index
    %5 = memref.load %arg3[%c0_3] : memref<4xf32, #tpu.memory_space<smem>>
    %6 = vector.broadcast %5 : f32 to vector<8x128xf32>
    %7 = arith.mulf %6, %1 : vector<8x128xf32>
    %c1 = arith.constant 1 : index
    %c0_4 = arith.constant 0 : index
    %c0_5 = arith.constant 0 : index
    %8 = vector.load %arg4[%c1, %c0_4, %c0_5] : memref<4x8x128xf32, #tpu.memory_space<vmem>>, vector<1x8x128xf32>
    %9 = vector.shape_cast %8 : vector<1x8x128xf32> to vector<8x128xf32>
    %c1_6 = arith.constant 1 : index
    %10 = memref.load %arg2[%c1_6] : memref<4xf32, #tpu.memory_space<smem>>
    %11 = vector.broadcast %10 : f32 to vector<8x128xf32>
    %12 = arith.mulf %11, %9 : vector<8x128xf32>
    %13 = arith.addf %4, %12 : vector<8x128xf32>
    %c1_7 = arith.constant 1 : index
    %14 = memref.load %arg3[%c1_7] : memref<4xf32, #tpu.memory_space<smem>>
    %15 = vector.broadcast %14 : f32 to vector<8x128xf32>
    %16 = arith.mulf %15, %9 : vector<8x128xf32>
    %17 = arith.addf %7, %16 : vector<8x128xf32>
    %c2 = arith.constant 2 : index
    %c0_8 = arith.constant 0 : index
    %c0_9 = arith.constant 0 : index
    %18 = vector.load %arg4[%c2, %c0_8, %c0_9] : memref<4x8x128xf32, #tpu.memory_space<vmem>>, vector<1x8x128xf32>
    %19 = vector.shape_cast %18 : vector<1x8x128xf32> to vector<8x128xf32>
    %c2_10 = arith.constant 2 : index
    %20 = memref.load %arg2[%c2_10] : memref<4xf32, #tpu.memory_space<smem>>
    %21 = vector.broadcast %20 : f32 to vector<8x128xf32>
    %22 = arith.mulf %21, %19 : vector<8x128xf32>
    %23 = arith.addf %13, %22 : vector<8x128xf32>
    %c2_11 = arith.constant 2 : index
    %24 = memref.load %arg3[%c2_11] : memref<4xf32, #tpu.memory_space<smem>>
    %25 = vector.broadcast %24 : f32 to vector<8x128xf32>
    %26 = arith.mulf %25, %19 : vector<8x128xf32>
    %27 = arith.addf %17, %26 : vector<8x128xf32>
    %c3 = arith.constant 3 : index
    %c0_12 = arith.constant 0 : index
    %c0_13 = arith.constant 0 : index
    %28 = vector.load %arg4[%c3, %c0_12, %c0_13] : memref<4x8x128xf32, #tpu.memory_space<vmem>>, vector<1x8x128xf32>
    %29 = vector.shape_cast %28 : vector<1x8x128xf32> to vector<8x128xf32>
    %c3_14 = arith.constant 3 : index
    %30 = memref.load %arg2[%c3_14] : memref<4xf32, #tpu.memory_space<smem>>
    %31 = vector.broadcast %30 : f32 to vector<8x128xf32>
    %32 = arith.mulf %31, %29 : vector<8x128xf32>
    %33 = arith.addf %23, %32 : vector<8x128xf32>
    %c3_15 = arith.constant 3 : index
    %34 = memref.load %arg3[%c3_15] : memref<4xf32, #tpu.memory_space<smem>>
    %35 = vector.broadcast %34 : f32 to vector<8x128xf32>
    %36 = arith.mulf %35, %29 : vector<8x128xf32>
    %37 = arith.addf %27, %36 : vector<8x128xf32>
    %c0_16 = arith.constant 0 : index
    %38 = memref.load %arg1[%c0_16] : memref<8xf32, #tpu.memory_space<smem>>
    %c1_17 = arith.constant 1 : index
    %39 = memref.load %arg1[%c1_17] : memref<8xf32, #tpu.memory_space<smem>>
    %c2_18 = arith.constant 2 : index
    %40 = memref.load %arg1[%c2_18] : memref<8xf32, #tpu.memory_space<smem>>
    %c3_19 = arith.constant 3 : index
    %41 = memref.load %arg1[%c3_19] : memref<8xf32, #tpu.memory_space<smem>>
    %c4 = arith.constant 4 : index
    %42 = memref.load %arg1[%c4] : memref<8xf32, #tpu.memory_space<smem>>
    %c5 = arith.constant 5 : index
    %43 = memref.load %arg1[%c5] : memref<8xf32, #tpu.memory_space<smem>>
    %c6 = arith.constant 6 : index
    %44 = memref.load %arg1[%c6] : memref<8xf32, #tpu.memory_space<smem>>
    %c7 = arith.constant 7 : index
    %45 = memref.load %arg1[%c7] : memref<8xf32, #tpu.memory_space<smem>>
    %46 = arith.addf %38, %39 : f32
    %47 = arith.addf %46, %43 : f32
    %48 = arith.subf %38, %39 : f32
    %49 = arith.addf %48, %43 : f32
    %50 = arith.subf %42, %43 : f32
    %51 = math.absf %37 : vector<8x128xf32>
    %cst = arith.constant 1.000000e+00 : f32
    %52 = vector.broadcast %cst : f32 to vector<8x128xf32>
    %53 = arith.addf %52, %51 : vector<8x128xf32>
    %54 = tpu.reciprocal %53 {approx = true} : vector<8x128xf32> -> vector<8x128xf32>
    %55 = arith.mulf %33, %54 : vector<8x128xf32>
    %56 = vector.broadcast %47 : f32 to vector<8x128xf32>
    %57 = arith.mulf %56, %33 : vector<8x128xf32>
    %58 = vector.broadcast %49 : f32 to vector<8x128xf32>
    %59 = arith.mulf %58, %37 : vector<8x128xf32>
    %60 = arith.addf %57, %59 : vector<8x128xf32>
    %61 = arith.mulf %33, %37 : vector<8x128xf32>
    %62 = vector.broadcast %40 : f32 to vector<8x128xf32>
    %63 = arith.mulf %62, %61 : vector<8x128xf32>
    %64 = arith.addf %60, %63 : vector<8x128xf32>
    %65 = vector.broadcast %41 : f32 to vector<8x128xf32>
    %66 = arith.mulf %65, %55 : vector<8x128xf32>
    %67 = arith.addf %64, %66 : vector<8x128xf32>
    %68 = arith.maximumf %33, %37 : vector<8x128xf32>
    %69 = vector.broadcast %50 : f32 to vector<8x128xf32>
    %70 = arith.mulf %69, %68 : vector<8x128xf32>
    %71 = arith.addf %67, %70 : vector<8x128xf32>
    %72 = math.sin %33 : vector<8x128xf32>
    %73 = vector.broadcast %44 : f32 to vector<8x128xf32>
    %74 = arith.mulf %73, %72 : vector<8x128xf32>
    %75 = arith.addf %71, %74 : vector<8x128xf32>
    %76 = math.cos %37 : vector<8x128xf32>
    %77 = vector.broadcast %45 : f32 to vector<8x128xf32>
    %78 = arith.mulf %77, %76 : vector<8x128xf32>
    %79 = arith.addf %75, %78 : vector<8x128xf32>
    %80 = math.tanh %79 : vector<8x128xf32>
    %c0_20 = arith.constant 0 : index
    %c0_21 = arith.constant 0 : index
    %81 = vector.load %arg5[%c0_20, %c0_21] : memref<8x128xf32, #tpu.memory_space<vmem>>, vector<8x128xf32>
    tpu.vector_store %arg5[%c0_20, %c0_21], %80 {strides = array<i32>} : memref<8x128xf32, #tpu.memory_space<vmem>>, vector<8x128xf32>,
    return
  }
  func.func @transform_0(%arg0: i32, %arg1: memref<8xf32, #tpu.memory_space<smem>>, %arg2: memref<4xf32, #tpu.memory_space<smem>>, %arg3: memref<4xf32, #tpu.memory_space<smem>>) -> (i32, i32, i32) {
    %c0_i32 = arith.constant 0 : i32
    %c0_i32_0 = arith.constant 0 : i32
    %c0_i32_1 = arith.constant 0 : i32
    return %c0_i32, %arg0, %c0_i32_0 : i32, i32, i32
  }
  func.func @transform_1(%arg0: i32, %arg1: memref<8xf32, #tpu.memory_space<smem>>, %arg2: memref<4xf32, #tpu.memory_space<smem>>, %arg3: memref<4xf32, #tpu.memory_space<smem>>) -> (i32, i32) {
    %c0_i32 = arith.constant 0 : i32
    %c0_i32_0 = arith.constant 0 : i32
    return %arg0, %c0_i32 : i32, i32
  }
}

</mosaic_0001>

<bundles_post_ra>
// kernel: tpu_custom_call.1
= control target key start
LH: loop header
LB: loop body
LE: loop exit
PB: predicated region body
PF: predicated region fallthrough
CT: control target
= control target key end

     0   :  { %s672_s0 = inlined_call_operand.hbm [shape: f32[8], index: 0, kind: input, shape index: {}]   ;;  %s673_s3 = inlined_call_operand.hbm [shape: f32[4,8,128], index: 3, kind: input, shape index: {}]   ;;  %s674_s4 = inlined_call_operand.hbm [shape: f32[8,128], index: 4, kind: output, shape index: {}]   ;;  %s675_s1 = inlined_call_operand.vmem [shape: f32[4], index: 1, kind: input, shape index: {}]   ;;  %s676_s2 = inlined_call_operand.vmem [shape: f32[4], index: 2, kind: input, shape index: {}]  }
   0x1   :  { %s392_s17 = scalar_lea.hbm %s672_s0, 16 }
   0x2   :  { %p393_p0 = scmp.ne.s32.totalorder %s672_s0, %s392_s17  ;;  %p396_p1 = scmp.lt.u32.totalorder %s392_s17, %s672_s0 }
   0x4   :  { %p398_p2 = pnand %p396_p1, %p393_p0 }
   0x6   :  { %401 = shalt.err (!%p398_p2)  }
   0x7   :  { %s476_s22 = smov [#allocation3]   ;;  %s11_s27 = sshll.u32 %s675_s1, 4  ;;  %s12_s27 = int_to_ptr.vmem [resolvable:$true] %s11_s27 }
   0x8   :  { %10 = dma.hbm_to_smem %s672_s0, 16, %s476_s22, [#allocation2] }
   0x9   :  { %s15_s30 = sshll.u32 %s676_s2, 4  ;;  %s402_s5 = scalar_lea.vmem %s12_s27, 16  ;;  %s16_s30 = int_to_ptr.vmem [resolvable:$true] %s15_s30 }
   0xa   :  { %p403_p3 = scmp.ne.s32.totalorder %s12_s27, %s402_s5  ;;  %p407_p4 = scmp.lt.s32.totalorder %s12_s27, %s12_s27 }
   0xb   :  { %p408_p5 = scmp.lt.s32.totalorder %s402_s5, %s402_s5 }
   0xd   :  { %p409_p6 = por %p408_p5, %p407_p4 }
   0xf   :  { %p410_p7 = pnand %p409_p6, %p403_p3 }
  0x11   :  { %413 = shalt.err (!%p410_p7)  }
  0x12   :  { %s477_s6 = smov [#allocation4]   ;;  %s414_s0 = scalar_lea.vmem %s16_s30, 16 }
  0x13   :  { %14 = dma.vmem_to_smem %s12_s27, 16, %s477_s6, [#allocation2] }
  0x14   :  { %p415_p8 = scmp.ne.s32.totalorder %s16_s30, %s414_s0  ;;  %p419_p9 = scmp.lt.s32.totalorder %s16_s30, %s16_s30 }
  0x15   :  { %p420_p10 = scmp.lt.s32.totalorder %s414_s0, %s414_s0 }
  0x17   :  { %p421_p11 = por %p420_p10, %p419_p9 }
  0x19   :  { %p422_p12 = pnand %p421_p11, %p415_p8 }
  0x1b   :  { %425 = shalt.err (!%p422_p12)  }
  0x1c   :  { %s478_s1 = smov [#allocation5]  }
  0x1d   :  { %18 = dma.vmem_to_smem %s16_s30, 16, %s478_s1, [#allocation2] }
  0x1e   :  { %470 = dma.done.wait [#allocation2], 48 }
  0x1f   :  { %471 = vsyncadd [#allocation2], 4294967248 }
  0x20   :  { %20 = sfence }
  0x21   :  { %21 = vsyncpa [#allocation7], 0 }
  0x22   :  { %22 = vsyncpa [#allocation8], 0  ;;  %s479_s2 = smov [#allocation6]   ;;  %s426_s10 = scalar_lea.hbm %s673_s3, 512 }
  0x23   :  { %s28_s7 = sshll.u32 %s479_s2, 4  ;;  %p427_p13 = scmp.ne.s32.totalorder %s673_s3, %s426_s10  ;;  %s29_s7 = int_to_ptr.vmem [resolvable:$true] %s28_s7 }
  0x24   :  { %p430_p0 = scmp.lt.u32.totalorder %s426_s10, %s673_s3 }
  0x26   :  { %p432_p1 = pnand %p430_p0, %p427_p13 }
  0x28   :  { %435 = shalt.err (!%p432_p1)
}
  0x29   :  { %s436_s15 = scalar_lea.vmem %s29_s7, 512  ;;  %p441_p3 = scmp.lt.s32.totalorder %s29_s7, %s29_s7 }
  0x2a   :  { %p437_p2 = scmp.ne.s32.totalorder %s29_s7, %s436_s15  ;;  %p442_p4 = scmp.lt.s32.totalorder %s436_s15, %s436_s15 }
  0x2c   :  { %p443_p5 = por %p442_p4, %p441_p3 }
  0x2e   :  { %p444_p6 = pnand %p443_p5, %p437_p2 }
  0x30   :  { %447 = shalt.err (!%p444_p6)
}
  0x31   :  { %s480_s16 = smov 128   ;;  %s481_s17 = smov 8  }
  0x32   :  { %34 = dma.hbm_to_vmem [thread:$0]  %s673_s3, 512, %s29_s7, [#allocation7], %s480_s16, %s480_s16, %s481_s17  }
  0x33   :  { %472 = dma.done.wait [#allocation7], 512  }
  0x34   :  { %473 = vsyncadd [#allocation7], 4294966784  ;;  %s39_s20 = sld [smem:[#allocation4]]  ;;  %s338_s22 = sld [smem:[#allocation4 + $0x1]]  ;;  %v38_v0 = vld [vmem:[#allocation6] sm:$0xff]  ;;  %v46_v3 = vld [vmem:[#allocation6 + $0x8] sm:$0xff] }
  0x35   :  { %s42_s21 = sld [smem:[#allocation5]]  ;;  %s339_s23 = sld [smem:[#allocation5 + $0x1]]  ;;  %v56_v4 = vld [vmem:[#allocation6 + $0x10] sm:$0xff]  ;;  %v66_v9 = vld [vmem:[#allocation6 + $0x18] sm:$0xff]  ;;  %v482_v42 = vmov 683565275  }
  0x36   :  { %s340_s24 = sld [smem:[#allocation4 + $0x2]]  ;;  %s342_s26 = sld [smem:[#allocation4 + $0x3]]  ;;  %v483_v44 = vmov 2475754826   ;;  %v484_v46 = vmov 2131351028  }
  0x37   :  { %s341_s25 = sld [smem:[#allocation5 + $0x2]]  ;;  %s343_s27 = sld [smem:[#allocation5 + $0x3]]  ;;  %v485_v48 = vmov 2102212464   ;;  %v486_v50 = vmov 920167782  }
  0x38   :  { %v487_v59 = vmov 1326507024   ;;  %s599_s3 = sld [smem:[#allocation3]]  ;;  %s601_s28 = sld [smem:[#allocation3 + $0x1]] }
  0x39   :  { %s603_s29 = sld [smem:[#allocation3 + $0x5]]  ;;  %s345_s6 = sld [smem:[#allocation3 + $0x2]] }
  0x3a   :  { %v40_v1 = vstv %s39_s20  ;;  %v48_v7 = vstv %s338_s22  ;;  %s631_s2 = sld [smem:[#allocation3 + $0x3]]  ;;  %s633_s7 = sld [smem:[#allocation3 + $0x4]] }
  0x3b   :  { %v43_v2 = vstv %s42_s21  ;;  %v41_v5 = vmul.f32 %v40_v1, %v38_v0  ;;  %v52_v8 = vstv %s339_s23  ;;  %v49_v10 = vmul.f32 %v48_v7, %v46_v3  ;;  %s349_s8 = sld [smem:[#allocation3 + $0x6]]  ;;  %s350_s10 = sld [smem:[#allocation3 + $0x7]] }
  0x3c   :  { %v44_v6 = vmul.f32 %v43_v2, %v38_v0  ;;  %v53_v11 = vmul.f32 %v52_v8, %v46_v3  ;;  %v58_v12 = vstv %s340_s24  ;;  %v68_v16 = vstv %s342_s26  ;;  %s488_s11 = smov [#allocation9]  }
  0x3d   :  { %v62_v13 = vstv %s341_s25  ;;  %v59_v14 = vmul.f32 %v58_v12, %v56_v4  ;;  %v50_v17 = vadd.f32 %v49_v10, %v41_v5  ;;  %v69_v19 = vmul.f32 %v68_v16, %v66_v9  ;;  %s329_s12 = sshll.u32 %s488_s11, 4  ;;  %s330_s12 = int_to_ptr.vmem [resolvable:$true] %s329_s12 }
  0x3e   :  { %v63_v15 = vmul.f32 %v62_v13, %v56_v4  ;;  %v54_v18 = vadd.f32 %v53_v11, %v44_v6  ;;  %v72_v20 = vstv %s343_s27  ;;  %s83_s30 = sadd.f32 %s601_s28, %s599_s3  ;;  %s448_s13 = scalar_lea.vmem %s330_s12, 128 }
  0x3f   :  { %v60_v21 = vadd.f32 %v59_v14, %v50_v17  ;;  %v73_v23 = vmul.f32 %v72_v20, %v66_v9  ;;  %s85_s5 = ssub.f32 %s599_s3, %s601_s28  ;;  %p449_p7 = scmp.ne.s32.totalorder %s330_s12, %s448_s13 }
  0x40   :  { %v64_v22 = vadd.f32 %v63_v15, %v54_v18  ;;  %s84_s0 = sadd.f32 %s603_s29, %s83_s30  ;;  %p453_p8 = scmp.lt.s32.totalorder %s330_s12, %s330_s12 }
  0x41   :  { %v544_v24 = vadd.f32 %v69_v19, %v60_v21  ;;  %s86_s1 = sadd.f32 %s603_s29, %s85_s5  ;;  %p454_p9 = scmp.lt.s32.totalorder %s448_s13, %s448_s13 }
  0x42   :  { %v546_v25 = vadd.f32 %v73_v23, %v64_v22  ;;  %s87_s9 = ssub.f32 %s633_s7, %s603_s29 }
  0x43   :  { %v111_v26 = vand.u32 2139095040, %v544_v24  ;;  %v108_v27 = vand.u32 2147483647, %v544_v24  ;;  %vm110_vm13 = vcmp.lt.s32.totalorder %v544_v24, 0  ;;  %p455_p10 = por %p454_p9, %p453_p8 }
  0x44   :  { %v218_v29 = vand.u32 2139095040, %v546_v25  ;;  %v554_v35 = vand.u32 2147483647, %v546_v25 }
  0x45   :  { %v112_v28 = vshrl.u32 %v111_v26, 23  ;;  %v115_v31 = vand.u32 8388607, %v108_v27  ;;  %vm609_vm14 = vcmp.le.f32.partialorder %v108_v27, 0.7853982  ;;  %p456_p11 = pnand %p455_p10, %p449_p7 }
  0x46   :  { %v219_v32 = vshrl.u32 %v218_v29, 23  ;;  %v222_v53 = vand.u32 8388607, %v554_v35 }
  0x47   :  { %v351_v30 = vadd.s32 4294967169, %v112_v28  ;;  %v116_v36 = vor.u32 8388608, %v115_v31 }
  0x48   :  { %v355_v34 = vadd.s32 4294967169, %v219_v32  ;;  %v223_v11 = vor.u32 8388608, %v222_v53 }
  0x49   :  { %v118_v33 = vadd.s32 1, %v351_v30  ;;  %v156_v52 = vshll.u32 %v116_v36, 8 }
  0x4a   :  { %v225_v40 = vadd.s32 1, %v355_v34  ;;  %v263_v23 = vshll.u32 %v223_v11, 8 }
  0x4b   :  { %vm119_vm0 = vcmp.gt.s32.totalorder %v118_v33, 0 }
  0x4c   :  { %v120_v37 = vsel %vm119_vm0, %v118_v33, 0  ;;  %vm226_vm2 = vcmp.gt.s32.totalorder %v225_v40, 0  ;;  %vm217_vm0 = vcmp.lt.s32.totalorder %v546_v25, 0 }
  0x4d   :  { %v122_v38 = vand.u32 31, %v120_v37  ;;  %v121_v39 = vshrl.u32 %v120_v37, 5  ;;  %v227_v12 = vsel %vm226_vm2, %v225_v40, 0 }
  0x4e   :  { %v228_v16 = vshrl.u32 %v227_v12, 5  ;;  %v229_v21 = vand.u32 31, %v227_v12 }
  0x4f   :  { %v123_v41 = vsub.s32 32, %v122_v38  ;;  %v125_v43 = vshll.u32 %v482_v42, %v122_v38  ;;  %v128_v45 = vshll.u32 %v483_v44, %v122_v38  ;;  %v131_v47 = vshll.u32 %v484_v46, %v122_v38 }
  0x50   :  { %v134_v49 = vshll.u32 %v485_v48, %v122_v38  ;;  %v137_v51 = vshll.u32 %v486_v50, %v122_v38  ;;  %vm140_vm1 = vcmp.lt.s32.totalorder %v121_v39, 1  ;;  %vm141_vm3 = vcmp.lt.s32.totalorder %v121_v39, 2 }
  0x51   :  { %v124_v54 = vshrl.u32 %v482_v42, %v123_v41  ;;  %v126_v55 = vshrl.u32 %v483_v44, %v123_v41  ;;  %v129_v56 = vshrl.u32 %v484_v46, %v123_v41  ;;  %v132_v57 = vshrl.u32 %v485_v48, %v123_v41 }
  0x52   :  { %v135_v58 = vshrl.u32 %v486_v50, %v123_v41  ;;  %v138_v60 = vshrl.u32 %v487_v59, %v123_v41  ;;  %vm142_vm4 = vcmp.lt.s32.totalorder %v121_v39, 3  ;;  %vm143_vm5 = vcmp.lt.s32.totalorder %v121_v39, 4 }
  0x53   :  { %v127_v61 = vor.u32 %v126_v55, %v125_v43  ;;  %v130_v62 = vor.u32 %v129_v56, %v128_v45  ;;  %v133_v63 = vor.u32 %v132_v57, %v131_v47  ;;  %v230_v26 = vsub.s32 32, %v229_v21 }
  0x54   :  { %v136_v0 = vor.u32 %v135_v58, %v134_v49  ;;  %v139_v1 = vor.u32 %v138_v60, %v137_v51  ;;  %v232_v28 = vshll.u32 %v482_v42, %v229_v21  ;;  %v235_v29 = vshll.u32 %v483_v44, %v229_v21 }
  0x55   :  { %v144_v2 = vsel %vm140_vm1, %v124_v54, %v127_v61  ;;  %v145_v3 = vsel %vm143_vm5, %v133_v63, 2102212464  ;;  %v148_v4 = vsel %vm140_vm1, %v127_v61, %v130_v62  ;;  %v152_v5 = vsel %vm140_vm1, %v130_v62, %v133_v63 }
  0x56   :  { %v146_v6 = vsel %vm142_vm4, %v130_v62, %v145_v3  ;;  %v149_v7 = vsel %vm143_vm5, %v136_v0, 920167782  ;;  %v153_v8 = vsel %vm143_vm5, %v139_v1, 1326507024  ;;  %v238_v30 = vshll.u32 %v484_v46, %v229_v21 }
  0x57   :  { %v150_v9 = vsel %vm142_vm4, %v133_v63, %v149_v7  ;;  %v154_v10 = vsel %vm142_vm4, %v136_v0, %v153_v8  ;;  %v147_v13 = vsel %vm141_vm3, %v144_v2, %v146_v6  ;;  %v241_v32 = vshll.u32 %v485_v48, %v229_v21 }
  0x58   :  { %v151_v14 = vsel %vm141_vm3, %v148_v4, %v150_v9  ;;  %v155_v15 = vsel %vm141_vm3, %v152_v5, %v154_v10  ;;  %v163_v22 = vmul.u32 %v156_v52, %v147_v13  ;;  %vm247_vm7 = vcmp.lt.s32.totalorder %v228_v16, 1 }
  0x59   :  { %v563_v17 = vmul.u32.u64.low %v156_v52, %v155_v15  ;;  %v564_v18 = vmul.u32.u64.high %v156_v52, %v155_v15, %v563_v17  ;;  %v566_v19 = vmul.u32.u64.low %v156_v52, %v151_v14  ;;  %v567_v20 = vmul.u32.u64.high %v156_v52, %v151_v14, %v566_v19 }
  0x5a   :  { %v233_v33 = vshrl.u32 %v483_v44, %v230_v26  ;;  %v236_v34 = vshrl.u32 %v484_v46, %v230_v26  ;;  %v239_v36 = vshrl.u32 %v485_v48, %v230_v26  ;;  %vm250_vm8 = vcmp.lt.s32.totalorder %v228_v16, 4 }
  0x5b   :  { %vm165_vm6 = vc.u32 %v564_v18, %v566_v19  ;;  %v166_v31 = vadd.s32 1, %v567_v20  ;;  %v242_v38 = vshrl.u32 %v486_v50, %v230_v26  ;;  %v244_v39 = vshll.u32 %v486_v50, %v229_v21 }
  0x5c   :  { %v245_v40 = vshrl.u32 %v487_v59, %v230_v26  ;;  %v234_v43 = vor.u32 %v233_v33, %v232_v28  ;;  %v237_v45 = vor.u32 %v236_v34, %v235_v29  ;;  %v240_v47 = vor.u32 %v239_v36, %v238_v30 }
  0x5d   :  { %v167_v37 = vsel %vm165_vm6, %v166_v31, %v567_v20  ;;  %v231_v49 = vshrl.u32 %v482_v42, %v230_v26  ;;  %v243_v51 = vor.u32 %v242_v38, %v241_v32  ;;  %vm249_vm9 = vcmp.lt.s32.totalorder %v228_v16, 3 }
  0x5e   :  { %v168_v41 = vadd.s32 %v167_v37, %v163_v22  ;;  %v246_v52 = vor.u32 %v245_v40, %v244_v39  ;;  %vm248_vm10 = vcmp.lt.s32.totalorder %v228_v16, 2  ;;  %v252_v44 = vsel %vm250_vm8, %v240_v47, 2102212464 }
  0x5f   :  { %v255_v46 = vsel %vm247_vm7, %v234_v43, %v237_v45  ;;  %v256_v48 = vsel %vm250_vm8, %v243_v51, 920167782  ;;  %v259_v50 = vsel %vm247_vm7, %v237_v45, %v240_v47  ;;  %v251_v42 = vsel %vm247_vm7, %v231_v49, %v234_v43 }
  0x60   :  { %v169_v53 = vadd.s32 536870912, %v168_v41  ;;  %v260_v54 = vsel %vm250_vm8, %v246_v52, 1326507024  ;;  %v257_v56 = vsel %vm249_vm9, %v240_v47, %v256_v48  ;;  %v253_v58 = vsel %vm249_vm9, %v237_v45, %v252_v44 }
  0x61   :  { %v261_v57 = vsel %vm249_vm9, %v243_v51, %v260_v54  ;;  %v258_v59 = vsel %vm248_vm10, %v255_v46, %v257_v56  ;;  %v254_v3 = vsel %vm248_vm10, %v251_v42, %v253_v58  ;;  %v164_v13 = vadd.s32 %v566_v19, %v564_v18 }
  0x62   :  { %v579_v55 = vshrl.u32 %v169_v53, 30  ;;  %v262_v60 = vsel %vm248_vm10, %v259_v50, %v261_v57  ;;  %v588_v0 = vmul.u32.u64.low %v263_v23, %v258_v59  ;;  %v589_v1 = vmul.u32.u64.high %v263_v23, %v258_v59, %v588_v0 }
  0x63   :  { %v585_v62 = vmul.u32.u64.low %v263_v23, %v262_v60  ;;  %v586_v63 = vmul.u32.u64.high %v263_v23, %v262_v60, %v585_v62  ;;  %v270_v5 = vmul.u32 %v263_v23, %v254_v3  ;;  %v89_v34 = vadd.f32 1.0, %v554_v35 }
  0x64   :  { %v171_v61 = vshll.u32 %v579_v55, 30  ;;  %v273_v6 = vadd.s32 1, %v589_v1  ;;  %v194_v40 = vsub.s32 4, %v579_v55  ;;  %v92_v57 = vstv %s84_s0 }
  0x65   :  { %vm272_vm11 = vc.u32 %v586_v63, %v588_v0  ;;  %380 = vrcp.f32 %v89_v34  ;;  %v94_v42 = vstv %s86_s1  ;;  %v97_v60 = vmul.f32 %v546_v25, %v544_v24 }
  0x66   :  { %v172_v2 = vsub.s32 %v168_v41, %v171_v61  ;;  %v274_v8 = vsel %vm272_vm11, %v273_v6, %v589_v1  ;;  %v271_v41 = vadd.s32 %v588_v0, %v586_v63  ;;  %v195_v52 = vsel %vm110_vm13, %v194_v40, %v579_v55 }
  0x67   :  { %v275_v10 = vadd.s32 %v274_v8, %v270_v5  ;;  %v197_v46 = vsel %vm609_vm14, 0, %v195_v52  ;;  %v93_v61 = vmul.f32 %v92_v57, %v544_v24  ;;  %v95_v62 = vmul.f32 %v94_v42, %v546_v25 }
  0x68   :  { %v174_v4 = vsub.s32 0, %v172_v2  ;;  %v201_v58 = vadd.s32 3, %v197_v46  ;;  %v98_v63 = vstv %s345_s6  ;;  %vm216_vm1 = vcmp.le.f32.partialorder %v554_v35, 0.7853982 }
  0x69   :  { %v276_v12 = vadd.s32 536870912, %v275_v10  ;;  %v99_v6 = vmul.f32 %v98_v63, %v97_v60  ;;  %vm200_vm5 = vweird.f32 %v544_v24  ;;  %vm307_vm9 = vweird.f32 %v546_v25 }
  0x6a   :  { %v352_v7 = vmin.u32 %v174_v4, %v172_v2  ;;  %v318_v38 = vstv %s350_s10 }
  0x6b   :  { %v596_v15 = vshrl.u32 %v276_v12, 30 }
  0x6c   :  { %v176_v9 = vclz %v352_v7  ;;  %v96_v7 = vadd.f32 %v95_v62, %v93_v61 }
  0x6d   :  { %v278_v21 = vshll.u32 %v596_v15, 30  ;;  %v301_v5 = vsub.s32 4, %v596_v15 }
  0x6e   :  { %v353_v11 = vadd.s32 4294967294, %v176_v9 }
  0x6f   :  { %v279_v26 = vsub.s32 %v275_v10, %v278_v21  ;;  %v381_v59 = vpop.eup %380 }
  0x70   :  { %vm354_vm12 = vcmp.lt.s32.totalorder %v353_v11, 0 }
  0x71   :  { %v179_v14 = vsel %vm354_vm12, 0, %v353_v11  ;;  %v281_v18 = vsub.s32 0, %v279_v26  ;;  %v91_v11 = vmul.f32 %v381_v59, %v544_v24 }
  0x72   :  { %v180_v16 = vsub.s32 32, %v179_v14  ;;  %v181_v17 = vshll.u32 %v172_v2, %v179_v14  ;;  %v184_v20 = vsub.s32 4294967266, %v179_v14  ;;  %v202_v2 = vand.u32 3, %v201_v58 }
  0x73   :  { %v356_v31 = vmin.u32 %v281_v18, %v279_v26  ;;  %v302_v14 = vsel %vm217_vm0, %v301_v5, %v596_v15 }
  0x74   :  { %v182_v22 = vshrl.u32 %v164_v13, %v180_v16  ;;  %v185_v23 = vadd.s32 127, %v184_v20  ;;  %vm204_vm2 = vcmp.eq.s32.totalorder %v202_v2, 0  ;;  %vm207_vm3 = vcmp.eq.s32.totalorder %v202_v2, 2 }
  0x75   :  { %v283_v33 = vclz %v356_v31  ;;  %v101_v13 = vstv %s631_s2  ;;  %vm203_vm4 = vcmp.lt.s32.totalorder %v202_v2, 2  ;;  %v100_v20 = vadd.f32 %v99_v6, %v96_v7 }
  0x76   :  { %v183_v28 = vor.u32 %v182_v22, %v181_v17  ;;  %v186_v29 = vshll.u32 %v185_v23, 23  ;;  %v102_v21 = vmul.f32 %v101_v13, %v91_v11  ;;  %v104_v22 = vmax.f32 %v544_v24, %v546_v25 }
  0x77   :  { %v357_v37 = vadd.s32 4294967294, %v283_v33  ;;  %v304_v23 = vsel %vm216_vm1, 0, %v302_v14 }
  0x78   :  { %v187_v19 = vor.u32 4788187, %v186_v29  ;;  %v190_v30 = vcvt.s32.f32 %v183_v28  ;;  %v308_v29 = vand.u32 3, %v304_v23  ;;  %v103_v15 = vadd.f32 %v102_v21, %v100_v20 }
  0x79   :  { %vm358_vm15 = vcmp.lt.s32.totalorder %v357_v37, 0 }
  0x7a   :  { %v188_v32 = vand.u32 2147483647, %v187_v19  ;;  %v286_v45 = vsel %vm358_vm15, 0, %v357_v37  ;;  %vm313_vm6 = vcmp.eq.s32.totalorder %v308_v29, 2  ;;  %vm310_vm7 = vcmp.eq.s32.totalorder %v308_v29, 0 }
  0x7b   :  { %v287_v47 = vsub.s32 32, %v286_v45  ;;  %v288_v49 = vshll.u32 %v279_v26, %v286_v45  ;;  %v291_v51 = vsub.s32 4294967266, %v286_v45  ;;  %v105_v26 = vstv %s87_s9 }
  0x7c   :  { %v191_v36 = vmul.f32 %v190_v30, %v188_v32  ;;  %v106_v18 = vmul.f32 %v105_v26, %v104_v22  ;;  %v212_v30 = vstv %s349_s8  ;;  %vm309_vm8 = vcmp.lt.s32.totalorder %v308_v29, 2 }
  0x7d   :  { %v289_v53 = vshrl.u32 %v271_v41, %v287_v47  ;;  %v292_v44 = vadd.s32 127, %v291_v51 }
  0x7e   :  { %v192_v39 = vxor.u32 2147483648, %v191_v36  ;;  %v107_v33 = vadd.f32 %v106_v18, %v103_v15 }
  0x7f   :  { %v290_v48 = vor.u32 %v289_v53, %v288_v49  ;;  %v293_v50 = vshll.u32 %v292_v44, 23 }
  0x80   :  { %v193_v43 = vsel %vm110_vm13, %v192_v39, %v191_v36 }
  0x81   :  { %v196_v27 = vsel %vm609_vm14, %v544_v24, %v193_v43  ;;  %v294_v54 = vor.u32 4788187, %v293_v50  ;;  %v297_v56 = vcvt.s32.f32 %v290_v48 }
  0x82   :  { %382 = vcosq.f32 %v196_v27 }
  0x83   :  { %384 = vsinq.f32 %v196_v27  ;;  %v295_v55 = vand.u32 2147483647, %v294_v54 }
  0x85   :  { %v298_v0 = vmul.f32 %v297_v56, %v295_v55 }
  0x87   :  { %v299_v4 = vxor.u32 2147483648, %v298_v0 }
  0x89   :  { %v300_v10 = vsel %vm217_vm0, %v299_v4, %v298_v0 }
  0x8a   :  { %v303_v12 = vsel %vm216_vm1, %v546_v25, %v300_v10 }
  0x8b   :  { %386 = vcosq.f32 %v303_v12 }
  0x8c   :  { %v383_v1 = vpop.eup %382  ;;  %388 = vsinq.f32 %v303_v12 }
  0x8d   :  { %v385_v3 = vpop.eup %384  ;;  %v208_v9 = vxor.u32 2147483648, %v383_v1 }
  0x8e   :  { %v205_v8 = vxor.u32 2147483648, %v385_v3 }
  0x8f   :  { %v209_v17 = vsel %vm207_vm3, %v208_v9, %v385_v3 }
  0x90   :  { %v206_v16 = vsel %vm204_vm2, %v383_v1, %v205_v8 }
  0x91   :  { %v210_v28 = vsel %vm203_vm4, %v206_v16, %v209_v17 }
  0x92   :  { %v211_v19 = vsel %vm200_vm5, nan, %v210_v28 }
  0x93   :  { %v213_v34 = vmul.f32 %v212_v30, %v211_v19 }
  0x95   :  { %v387_v31 = vpop.eup %386  ;;  %v214_v39 = vadd.f32 %v213_v34, %v107_v33 }
  0x96   :  { %v389_v32 = vpop.eup %388  ;;  %v314_v36 = vxor.u32 2147483648, %v387_v31 }
  0x97   :  { %v311_v35 = vxor.u32 2147483648, %v389_v32 }
  0x98   :  { %v315_v37 = vsel %vm313_vm6, %v314_v36, %v389_v32 }
  0x99   :  { %v312_v24 = vsel %vm310_vm7, %v387_v31, %v311_v35 }
  0x9a   :  { %v316_v40 = vsel %vm309_vm8, %v312_v24, %v315_v37 }
  0x9b   :  { %v317_v41 = vsel %vm307_vm9, nan, %v316_v40 }
  0x9c   :  { %v319_v43 = vmul.f32 %v318_v38, %v317_v41 }
  0x9e   :  { %v320_v45 = vadd.f32 %v319_v43, %v214_v39 }
  0xa0   :  { %390 = vtanh.f32 %v320_v45 }
  0xaa   :  { %v391_v27 = vpop.eup %390 }
  0xab   :  { %322 = vst [vmem:[#allocation9] sm:$0xff] %v391_v27 }
  0xac   :  { %459 = shalt.err (!%p456_p11)
}
  0xad   :  { %s460_s16 = scalar_lea.hbm %s674_s4, 128 }
  0xae   :  { %p461_p12 = scmp.ne.s32.totalorder %s674_s4, %s460_s16  ;;  %p464_p13 = scmp.lt.u32.totalorder %s460_s16, %s674_s4 }
  0xb0   :  { %p466_p0 = pnand %p464_p13, %p461_p12 }
  0xb2   :  { %469 = shalt.err (!%p466_p0)
}
  0xb3   :  { %332 = dma.vmem_to_hbm [thread:$0]  %s330_s12, 128, %s674_s4, [#allocation8]  }
  0xb4   :  { %474 = dma.done.wait [#allocation8], 128  }
  0xb5   :  { %475 = vsyncadd [#allocation8], 4294967168 }
  0xb6   :  { %336 = vsyncpa [#allocation7], 1 }
  0xb7   :  { %337 = vsyncpa [#allocation8], 1 }

</bundles_post_ra>
